<compile_context>
chip_gen: v5e
topology: v5e:2x2
jax: 0.10.0
libtpu: 0.0.40
codegen_flags: <defaults>
</compile_context>

<pallas_src>
import functools

import jax
import jax.numpy as jnp
from jax.experimental import pallas as pl
from jax.experimental.pallas import tpu as pltpu


def _adaptive_hgnn_kernel(
    xlp_ref,    # VMEM (TN, M*L*F + M*C)  packed [hop features | label-prop feats]
    w1_ref,     # VMEM (K, M*H + C)       blockdiag(alpha-folded conv W, stacked wlp/M)
    b1_ref,     # VMEM (1, M*H + C)       [concat conv biases | zeros]  (f32)
    w2_ref,     # VMEM (M*H + C, C)       [stacked wlin / M ; I_C]
    b2_ref,     # VMEM (1, C)             blin + blp  (f32)
    out_ref,    # VMEM (TN, C)            log-softmax output
    *, mh):
    # Stage 1: one wide MXU matmul does all M metapath convolutions AND the
    # label-prop projection (block-diagonal weight).  f32 accumulation.
    z = jnp.dot(xlp_ref[...], w1_ref[...], preferred_element_type=jnp.float32)
    z = z + b1_ref[...]

    # ReLU only on the conv columns (lanes < M*H); prop columns pass through.
    lane = jax.lax.broadcasted_iota(jnp.int32, z.shape, 1)
    z = jnp.where(lane < mh, jnp.maximum(z, 0.0), z)

    # Stage 2: mean-over-metapaths + lin (folded into stacked/scaled weight) and
    # "+ prop" (identity block) in one matmul, plus the fused output bias.
    logits = jnp.dot(z.astype(w2_ref.dtype), w2_ref[...],
                     preferred_element_type=jnp.float32) + b2_ref[...]

    # log_softmax over the class dim (f32 elementwise; safe on v5e's non-bf16 VPU).
    mx = jnp.max(logits, axis=-1, keepdims=True)
    shifted = logits - mx
    lse = jnp.log(jnp.sum(jnp.exp(shifted), axis=-1, keepdims=True))
    out_ref[...] = (shifted - lse).astype(out_ref.dtype)


def _lane_pad(n):
    return ((n + 127) // 128) * 128


def _round_up(n, m):
    return ((n + m - 1) // m) * m


def adaptive_hgnn_forward(alpha, mps, lps, wconv, bconv, wlin, blin, wlp, blp,
                          *, compute_dtype=jnp.bfloat16, out_dtype=None,
                          tile_n=None, vmem_limit_bytes=None):
    """alpha: (M, L) softmax hop weights; mps: (M, L, N, F); lps: (M, N, C).
    Streams node tiles through VMEM; folded weights stay resident."""
    assert jnp.issubdtype(jnp.dtype(compute_dtype), jnp.floating)
    if out_dtype is None:
        out_dtype = compute_dtype

    M, L, N, F = mps.shape
    H = wconv.shape[2]
    C = wlin.shape[1]
    MLF, MH, MC = M * L * F, M * H, M * C
    Kin = MLF + MC            # streamed feature width per node
    Wz = MH + C               # stage-1 output width

    # ---- wrapper-side repacking & weight folding (plain XLA, runs once) ----
    # Lane-dense node-major layout: one streamed slab per node.
    x_packed = jnp.transpose(mps, (2, 0, 1, 3)).reshape(N, MLF)    # (N, M*L*F)
    lp_packed = jnp.transpose(lps, (1, 0, 2)).reshape(N, MC)       # (N, M*C)
    xlp = jnp.concatenate([x_packed, lp_packed], axis=1)           # (N, Kin)

    # Fold alpha hop-mix into conv weights, then block-diagonalize over metapaths;
    # append the 1/M-stacked lin_lp block so prop falls out of the same matmul.
    w_eff = (alpha[:, :, None, None] * wconv[:, None, :, :]).reshape(M, L * F, H)
    w1 = jnp.zeros((Kin, Wz), jnp.float32)
    for m in range(M):
        w1 = w1.at[m * L * F:(m + 1) * L * F, m * H:(m + 1) * H].set(w_eff[m])
    wlp_big = jnp.concatenate([wlp] * M, axis=0) * (1.0 / M)       # (M*C, C)
    w1 = w1.at[MLF:, MH:].set(wlp_big)
    b1 = jnp.concatenate([bconv.reshape(1, MH).astype(jnp.float32),
                          jnp.zeros((1, C), jnp.float32)], axis=1)  # (1, Wz)

    # Stage-2 weight: mean-over-metapaths folded into stacked/scaled wlin, plus an
    # identity block that carries prop straight through.  Output bias = blin + blp.
    w2 = jnp.concatenate([jnp.concatenate([wlin] * M, axis=0) * (1.0 / M),
                          jnp.eye(C, dtype=jnp.float32)], axis=0)   # (Wz, C)
    b2 = (blin + blp).astype(jnp.float32)                           # (1, C)

    xlp = xlp.astype(compute_dtype)
    w1 = w1.astype(compute_dtype)
    w2 = w2.astype(compute_dtype)

    in_isz = jnp.dtype(compute_dtype).itemsize
    out_isz = jnp.dtype(out_dtype).itemsize
    sub_mult = 16 if in_isz == 2 else (32 if in_isz == 1 else 8)

    # ---- per-chip VMEM limit (v7x: 64 MiB physical -> ~48 MiB; v5e/v6e: ~96 MiB) ----
    if vmem_limit_bytes is None:
        try:
            cap = getattr(pltpu.get_tpu_info(), "vmem_capacity_bytes",
                          128 * 1024 * 1024)
            vmem_limit_bytes = min(int(cap * 3 // 4), 96 * 1024 * 1024)
        except Exception:
            vmem_limit_bytes = 48 * 1024 * 1024

    # ---- node-tile selection with lane-padded VMEM accounting ----
    # Resident weights (conservatively doubled for BlockSpec buffering).
    w_bytes = 2 * (_round_up(Kin, 8) * _lane_pad(Wz) * in_isz
                   + 8 * _lane_pad(Wz) * 4
                   + _round_up(Wz, 8) * _lane_pad(C) * in_isz
                   + 8 * _lane_pad(C) * 4)
    # Per-row footprint: double-buffered input + output streams and ~4 f32
    # full-width intermediates (z / masked-relu / logits / exp) inside the body.
    bytes_per_row = (2 * _lane_pad(Kin) * in_isz
                     + 2 * _lane_pad(C) * out_isz
                     + 4 * _lane_pad(Wz) * 4)
    if tile_n is None:
        budget = max(vmem_limit_bytes - w_bytes - (4 << 20), 4 << 20)
        tile_n = budget // bytes_per_row
        tile_n = min(tile_n, 8192)                 # per-step DMA already >> overhead
    tile_n = max(sub_mult, (tile_n // sub_mult) * sub_mult)
    tile_n = min(tile_n, _round_up(N, sub_mult))
    # Keep at least 2 node tiles when N allows so v7x can feed both TensorCores.
    if (N + tile_n - 1) // tile_n == 1 and N >= 2 * sub_mult:
        tile_n = _round_up((N + 1) // 2, sub_mult)

    n_blocks = (N + tile_n - 1) // tile_n
    n_pad = n_blocks * tile_n
    if n_pad != N:
        xlp = jnp.pad(xlp, ((0, n_pad - N), (0, 0)))

    def resident(a):  # weight resident across the whole grid (constant block index)
        return pl.BlockSpec(a.shape, lambda i, _nd=a.ndim: (0,) * _nd)

    kernel = functools.partial(_adaptive_hgnn_kernel, mh=MH)

    out_pad = pl.pallas_call(
        kernel,
        out_shape=jax.ShapeDtypeStruct((n_pad, C), out_dtype),
        grid_spec=pltpu.PrefetchScalarGridSpec(
            num_scalar_prefetch=0,
            grid=(n_blocks,),
            in_specs=[
                pl.BlockSpec((tile_n, Kin), lambda i: (i, 0)),
                resident(w1), resident(b1), resident(w2), resident(b2),
            ],
            out_specs=pl.BlockSpec((tile_n, C), lambda i: (i, 0)),
        ),
        compiler_params=pltpu.CompilerParams(
            dimension_semantics=("parallel",),     # shard node tiles across TCs (v7x)
            vmem_limit_bytes=vmem_limit_bytes,
        ),
    )(xlp, w1, b1, w2, b2)

    return out_pad[:N]


def reference_jax(alpha, mps, lps, wconv, bconv, wlin, blin, wlp, blp):
    # Pure-JAX (f32) reference mirroring the PyTorch forward, unfolded.
    comb = jnp.einsum("ml,mlnf->mnf", alpha, mps)
    h = jnp.einsum("mnf,mfh->mnh", comb, wconv) + bconv           # (M, N, H)
    outs = jax.nn.relu(h)
    out = jnp.mean(outs, axis=0) @ wlin + blin[0]
    prop = jnp.mean(lps, axis=0) @ wlp + blp[0]
    return jax.nn.log_softmax(out + prop, axis=-1)


if __name__ == "__main__":
    # Shapes consistent with the module:
    #   metapaths = [["A","B","A"], ["A","C","A"]] -> M=2 metapaths, L=3 hops,
    #   in_channels F=8, hidden H=32, out C=8, N=512 nodes.
    M, L, N, F, H, C = 2, 3, 512, 8, 32, 8

    key = jax.random.PRNGKey(0)
    k = jax.random.split(key, 10)

    # Inputs (what the caller would pass as pre_calculated_mps / _lps).
    mps = jax.random.normal(k[0], (M, L, N, F), jnp.float32)
    lps = jax.random.normal(k[1], (M, N, C), jnp.float32)

    # Deterministic synthetic parameters (module __init__ shapes).
    alpha = jax.nn.softmax(jax.random.normal(k[2], (M, L), jnp.float32), axis=-1)
    wconv = jax.random.normal(k[3], (M, F, H), jnp.float32) * 0.1
    bconv = jax.random.normal(k[4], (M, 1, H), jnp.float32) * 0.1
    wlin = jax.random.normal(k[5], (H, C), jnp.float32) * 0.1
    blin = jax.random.normal(k[6], (1, C), jnp.float32) * 0.1
    wlp = jax.random.normal(k[7], (C, C), jnp.float32) * 0.1
    blp = jax.random.normal(k[8], (1, C), jnp.float32) * 0.1

    ref = reference_jax(alpha, mps, lps, wconv, bconv, wlin, blin, wlp, blp)

    # f32 path: exact-math check against the unfolded reference.
    out_f32 = adaptive_hgnn_forward(alpha, mps, lps, wconv, bconv, wlin, blin,
                                    wlp, blp, compute_dtype=jnp.float32,
                                    tile_n=128)
    out_f32 = jax.block_until_ready(out_f32)
    assert out_f32.shape == (N, C)
    assert jnp.allclose(out_f32, ref, atol=1e-4, rtol=1e-4), "f32 mismatch vs reference"

    # bf16 path (default, optimized): auto tile sizing, bf16 stream/store,
    # looser tolerance for half-precision inputs.
    out_bf16 = adaptive_hgnn_forward(alpha, mps, lps, wconv, bconv, wlin, blin,
                                     wlp, blp, compute_dtype=jnp.bfloat16)
    out_bf16 = jax.block_until_ready(out_bf16)
    assert out_bf16.shape == (N, C)
    assert jnp.allclose(out_bf16.astype(jnp.float32), ref,
                        atol=5e-2, rtol=5e-2), "bf16 mismatch vs reference"

    print("KERNEL_OK")
</pallas_src>

<mosaic_0001>
module attributes {stable_mosaic.version = 11 : i64} {
  func.func @_adaptive_hgnn_kernel(%arg0: i32, %arg1: memref<128x64xf32, #tpu.memory_space<vmem>>, %arg2: memref<64x72xf32, #tpu.memory_space<vmem>>, %arg3: memref<1x72xf32, #tpu.memory_space<vmem>>, %arg4: memref<72x8xf32, #tpu.memory_space<vmem>>, %arg5: memref<1x8xf32, #tpu.memory_space<vmem>>, %arg6: memref<128x8xf32, #tpu.memory_space<vmem>>) attributes {dimension_semantics = [#tpu.dimension_semantics<parallel>], iteration_bounds = array<i64: 4>, scalar_prefetch = 0 : i64, scratch_operands = 0 : i64, tpu.core_type = #tpu.core_type<tc>, window_params = [{transform_indices = @transform_0, window_bounds = array<i64: 128, 64>}, {pipeline_mode = #tpu.pipeline_mode<synchronous>, transform_indices = @transform_1, window_bounds = array<i64: 64, 72>}, {pipeline_mode = #tpu.pipeline_mode<synchronous>, transform_indices = @transform_2, window_bounds = array<i64: 1, 72>}, {pipeline_mode = #tpu.pipeline_mode<synchronous>, transform_indices = @transform_3, window_bounds = array<i64: 72, 8>}, {pipeline_mode = #tpu.pipeline_mode<synchronous>, transform_indices = @transform_4, window_bounds = array<i64: 1, 8>}, {transform_indices = @transform_5, window_bounds = array<i64: 128, 8>}]} {
    %c0 = arith.constant 0 : index
    %c0_0 = arith.constant 0 : index
    %0 = vector.load %arg1[%c0, %c0_0] : memref<128x64xf32, #tpu.memory_space<vmem>>, vector<128x64xf32>
    %c0_1 = arith.constant 0 : index
    %c0_2 = arith.constant 0 : index
    %1 = vector.load %arg2[%c0_1, %c0_2] : memref<64x72xf32, #tpu.memory_space<vmem>>, vector<64x72xf32>
    %cst = arith.constant dense<0.000000e+00> : vector<128x72xf32>
    %2 = tpu.matmul %0, %1, %cst {dimension_numbers = #tpu.dot_dimension_numbers<[1], [0], [0], [1], [0, 0, 1, 1], [], []>} : vector<128x64xf32>, vector<64x72xf32>, vector<128x72xf32> -> vector<128x72xf32>
    %c0_3 = arith.constant 0 : index
    %c0_4 = arith.constant 0 : index
    %3 = vector.load %arg3[%c0_3, %c0_4] : memref<1x72xf32, #tpu.memory_space<vmem>>, vector<1x72xf32>
    %4 = vector.broadcast %3 : vector<1x72xf32> to vector<128x72xf32>
    %5 = arith.addf %2, %4 : vector<128x72xf32>
    %6 = tpu.iota {dimensions = array<i32: 1>} : vector<128x72xi32>
    %c64_i32 = arith.constant 64 : i32
    %7 = vector.broadcast %c64_i32 : i32 to vector<128x72xi32>
    %8 = arith.cmpi slt, %6, %7 : vector<128x72xi32>
    %cst_5 = arith.constant 0.000000e+00 : f32
    %9 = vector.broadcast %cst_5 : f32 to vector<128x72xf32>
    %10 = arith.maximumf %5, %9 : vector<128x72xf32>
    %11 = arith.select %8, %10, %5 : vector<128x72xi1>, vector<128x72xf32>
    %c0_6 = arith.constant 0 : index
    %c0_7 = arith.constant 0 : index
    %12 = vector.load %arg4[%c0_6, %c0_7] : memref<72x8xf32, #tpu.memory_space<vmem>>, vector<72x8xf32>
    %cst_8 = arith.constant dense<0.000000e+00> : vector<128x8xf32>
    %13 = tpu.matmul %11, %12, %cst_8 {dimension_numbers = #tpu.dot_dimension_numbers<[1], [0], [0], [1], [0, 0, 1, 1], [], []>} : vector<128x72xf32>, vector<72x8xf32>, vector<128x8xf32> -> vector<128x8xf32>
    %c0_9 = arith.constant 0 : index
    %c0_10 = arith.constant 0 : index
    %14 = vector.load %arg5[%c0_9, %c0_10] : memref<1x8xf32, #tpu.memory_space<vmem>>, vector<1x8xf32>
    %15 = vector.broadcast %14 : vector<1x8xf32> to vector<128x8xf32>
    %16 = arith.addf %13, %15 : vector<128x8xf32>
    %cst_11 = arith.constant dense<0xFF800000> : vector<128xf32>
    %17 = vector.multi_reduction <maximumf>, %16, %cst_11 [1] : vector<128x8xf32> to vector<128xf32>
    %18 = vector.shape_cast %17 : vector<128xf32> to vector<128x1xf32>
    %19 = vector.broadcast %18 : vector<128x1xf32> to vector<128x8xf32>
    %20 = arith.subf %16, %19 : vector<128x8xf32>
    %21 = math.exp %20 : vector<128x8xf32>
    %cst_12 = arith.constant dense<0.000000e+00> : vector<128xf32>
    %22 = vector.multi_reduction <add>, %21, %cst_12 [1] : vector<128x8xf32> to vector<128xf32>
    %23 = vector.shape_cast %22 : vector<128xf32> to vector<128x1xf32>
    %24 = math.log %23 : vector<128x1xf32>
    %25 = vector.broadcast %24 : vector<128x1xf32> to vector<128x8xf32>
    %26 = arith.subf %20, %25 : vector<128x8xf32>
    %c0_13 = arith.constant 0 : index
    %c0_14 = arith.constant 0 : index
    %27 = vector.load %arg6[%c0_13, %c0_14] : memref<128x8xf32, #tpu.memory_space<vmem>>, vector<128x8xf32>
    tpu.vector_store %arg6[%c0_13, %c0_14], %26 {strides = array<i32>} : memref<128x8xf32, #tpu.memory_space<vmem>>, vector<128x8xf32>,
    return
  }
  func.func @transform_0(%arg0: i32) -> (i32, i32) {
    %c0_i32 = arith.constant 0 : i32
    %c0_i32_0 = arith.constant 0 : i32
    return %arg0, %c0_i32 : i32, i32
  }
  func.func @transform_1(%arg0: i32) -> (i32, i32) {
    %c0_i32 = arith.constant 0 : i32
    %c0_i32_0 = arith.constant 0 : i32
    %c0_i32_1 = arith.constant 0 : i32
    return %c0_i32, %c0_i32_0 : i32, i32
  }
  func.func @transform_2(%arg0: i32) -> (i32, i32) {
    %c0_i32 = arith.constant 0 : i32
    %c0_i32_0 = arith.constant 0 : i32
    %c0_i32_1 = arith.constant 0 : i32
    return %c0_i32, %c0_i32_0 : i32, i32
  }
  func.func @transform_3(%arg0: i32) -> (i32, i32) {
    %c0_i32 = arith.constant 0 : i32
    %c0_i32_0 = arith.constant 0 : i32
    %c0_i32_1 = arith.constant 0 : i32
    return %c0_i32, %c0_i32_0 : i32, i32
  }
  func.func @transform_4(%arg0: i32) -> (i32, i32) {
    %c0_i32 = arith.constant 0 : i32
    %c0_i32_0 = arith.constant 0 : i32
    %c0_i32_1 = arith.constant 0 : i32
    return %c0_i32, %c0_i32_0 : i32, i32
  }
  func.func @transform_5(%arg0: i32) -> (i32, i32) {
    %c0_i32 = arith.constant 0 : i32
    %c0_i32_0 = arith.constant 0 : i32
    return %arg0, %c0_i32 : i32, i32
  }
}

</mosaic_0001>

<bundles_post_ra>
// kernel: tpu_custom_call.1
= control target key start
LH: loop header
LB: loop body
LE: loop exit
PB: predicated region body
PF: predicated region fallthrough
CT: control target
= control target key end

     0   :  { %s969_s18 = smov 0   ;;  %s1357_s0 = inlined_call_operand.vmem [shape: f32[512,64], index: 0, kind: input, shape index: {}]   ;;  %s1358_s1 = inlined_call_operand.vmem [shape: f32[64,72], index: 1, kind: input, shape index: {}]   ;;  %s1359_s2 = inlined_call_operand.vmem [shape: f32[1,72], index: 2, kind: input, shape index: {}]   ;;  %s1360_s3 = inlined_call_operand.vmem [shape: f32[72,8], index: 3, kind: input, shape index: {}]   ;;  %s1361_s4 = inlined_call_operand.vmem [shape: f32[1,8], index: 4, kind: input, shape index: {}]   ;;  %s1362_s5 = inlined_call_operand.vmem [shape: f32[512,8], index: 5, kind: output, shape index: {}]  }
   0x1 LB: > { %s797_s19 = sadd.s32 4294967295, %s937_s18   ;;  %p801_p0 = scmp.ge.s32.totalorder %s937_s18, 1  ;;  %s937_s18 = sphi %s969_s18, %s15_s18  }
   0x2   : > { %p188_p1 = scmp.lt.s32.totalorder %s937_s18, 5 }
   0x4   : > { %p189_p2 = pnand %p801_p0, %p188_p1 }
   0x5   : > { %s802_s24 = sshll.u32 (!%p189_p2), %s797_s19, 4 }
   0x6   : > { %192 = sbr.rel (%p189_p2) target bundleno = 669 (0x29d), region = 40  ;;  %p217_p3 = scmp.lt.s32.totalorder (!%p189_p2), %s802_s24, 63 }
   0xb   : > { %v251_v0 = vld [vmem:[%s1358_s1 + $0x38] sm:$0xff]  ;;  %v250_v1 = vld [vmem:[%s1358_s1 + $0x30] sm:$0xff]  ;;  %v249_v2 = vld [vmem:[%s1358_s1 + $0x28] sm:$0xff]  ;;  %s1364_s24 = smov (!%p217_p3, %s802_s24), 63  ;;  %vm256_vm0 = vcmask 523264   ;;  %v370_v33 = vlaneseq  ;;  %vm418_vm2 = vcmask 588800  }
   0xc   : > { %313 = vmatpush.msra.mxu0 %v251_v0  ;;  %840 = vmatpush.msra.mxu3 %v251_v0  ;;  %v248_v3 = vld [vmem:[%s1358_s1 + $0x20] sm:$0xff]  ;;  %v247_v4 = vld [vmem:[%s1358_s1 + $0x18] sm:$0xff]  ;;  %s803_s6 = sshll.u32 %s1364_s24, 3  ;;  %v246_v5 = vld [vmem:[%s1358_s1 + $0x10] sm:$0xff]  ;;  %vm532_vm3 = vcmask 64512  }
   0xd   : > { %v245_v6 = vld [vmem:[%s1358_s1 + $0x8] sm:$0xff]  ;;  %s1006_s13 = scalar_lea.vmem %s1357_s0, %s803_s6  ;;  %v244_v7 = vld [vmem:[%s1358_s1] sm:$0xff]  ;;  %v412_v19 = vld [vmem:[%s1360_s3 + $0x38] sm:$0xff]  ;;  %v1075_v35 = vand.u32 127, %v370_v33  ;;  %s1303_s19 = scalar_lea.vmem %s1362_s5, %s803_s6 }
   0xe   : > { %314 = vmatpush.msra.mxu0 %v250_v1  ;;  %841 = vmatpush.msra.mxu3 %v250_v1  ;;  %v228_v8 = vld [vmem:[%s1006_s13] sm:$0xff]  ;;  %v229_v9 = vld [vmem:[%s1006_s13 + $0x8] sm:$0xff]  ;;  %v230_v10 = vld [vmem:[%s1006_s13 + $0x10] sm:$0xff] }
   0xf   : > { %v231_v11 = vld [vmem:[%s1006_s13 + $0x18] sm:$0xff]  ;;  %v232_v12 = vld [vmem:[%s1006_s13 + $0x20] sm:$0xff]  ;;  %v237_v13 = vld [vmem:[%s1006_s13 + $0x48] sm:$0xff]  ;;  %vm372_vm1 = vcmp.lt.s32.totalorder %v1075_v35, 64 }
  0x10   : > { %315 = vmatpush.msra.mxu0 %v249_v2  ;;  %842 = vmatpush.msra.mxu3 %v249_v2  ;;  %v233_v14 = vld [vmem:[%s1006_s13 + $0x28] sm:$0xff]  ;;  %v238_v15 = vld [vmem:[%s1006_s13 + $0x50] sm:$0xff]  ;;  %v239_v17 = vld [vmem:[%s1006_s13 + $0x58] sm:$0xff] }
  0x11   : > { %v234_v16 = vld [vmem:[%s1006_s13 + $0x30] sm:$0xff]  ;;  %v413_v18 = vld [vmem:[%s1360_s3 + $0x40] sm:$0xff]  ;;  %v410_v21 = vld [vmem:[%s1360_s3 + $0x28] sm:$0xff] }
  0x12   : > { %316 = vmatpush.msra.mxu0 %v248_v3  ;;  %843 = vmatpush.msra.mxu3 %v248_v3  ;;  %v411_v20 = vld [vmem:[%s1360_s3 + $0x30] sm:$0xff]  ;;  %v235_v22 = vld [vmem:[%s1006_s13 + $0x38] sm:$0xff]  ;;  %v240_v23 = vld [vmem:[%s1006_s13 + $0x60] sm:$0xff] }
  0x13   : > { %474 = vmatpush.msra.mxu1 %v413_v18  ;;  %848 = vmatpush.msra.mxu2 %v413_v18  ;;  %v409_v24 = vld [vmem:[%s1360_s3 + $0x20] sm:$0xff]  ;;  %v408_v25 = vld [vmem:[%s1360_s3 + $0x18] sm:$0xff]  ;;  %v241_v27 = vld [vmem:[%s1006_s13 + $0x68] sm:$0xff] }
  0x14   : > { %317 = vmatpush.msra.mxu0 %v247_v4  ;;  %844 = vmatpush.msra.mxu3 %v247_v4  ;;  %v236_v26 = vld [vmem:[%s1006_s13 + $0x40] sm:$0xff]  ;;  %v242_v28 = vld [vmem:[%s1006_s13 + $0x70] sm:$0xff]  ;;  %v243_v29 = vld [vmem:[%s1006_s13 + $0x78] sm:$0xff] }
  0x15   : > { %475 = vmatpush.msra.mxu1 %v412_v19  ;;  %849 = vmatpush.msra.mxu2 %v412_v19  ;;  %v407_v30 = vld [vmem:[%s1360_s3 + $0x10] sm:$0xff]  ;;  %v406_v31 = vld [vmem:[%s1360_s3 + $0x8] sm:$0xff]  ;;  %v405_v32 = vld [vmem:[%s1360_s3] sm:$0xff] }
  0x16   : > { %318 = vmatpush.msra.mxu0 %v246_v5  ;;  %845 = vmatpush.msra.mxu3 %v246_v5  ;;  %v1073_v34 = vld [vmem:[%s1359_s2] ss:$0 sm:$0xff] }
  0x17   : > { %476 = vmatpush.msra.mxu1 %v411_v20  ;;  %850 = vmatpush.msra.mxu2 %v411_v20 }
  0x18   : > { %319 = vmatpush.msra.mxu0 %v245_v6  ;;  %846 = vmatpush.msra.mxu3 %v245_v6 }
  0x19   : > { %477 = vmatpush.msra.mxu1 %v410_v21  ;;  %851 = vmatpush.msra.mxu2 %v410_v21 }
  0x1a   : > { %320 = vmatpush.msra.mxu0 %v244_v7  ;;  %847 = vmatpush.msra.mxu3 %v244_v7 }
  0x1b   : > { %806 = vmatmul.msk.f32.vlgmr.msra.gmra.mxu0 %vm256_vm0, %v228_v8  ;;  %815 = vmatmul.msk.f32.vlgmr.msra.gmra.mxu3 %vm256_vm0, %v237_v13 }
  0x1c   : > { %478 = vmatpush.msra.mxu1 %v409_v24  ;;  %852 = vmatpush.msra.mxu2 %v409_v24 }
  0x1e   : > { %479 = vmatpush.msra.mxu1 %v408_v25  ;;  %853 = vmatpush.msra.mxu2 %v408_v25 }
  0x20   : > { %480 = vmatpush.msra.mxu1 %v407_v30  ;;  %854 = vmatpush.msra.mxu2 %v407_v30 }
  0x22   : > { %481 = vmatpush.msra.mxu1 %v406_v31  ;;  %855 = vmatpush.msra.mxu2 %v406_v31 }
  0x23   : > { %807 = vmatmul.msk.f32.gmra.mxu0 %vm256_vm0, %v229_v9  ;;  %816 = vmatmul.msk.f32.gmra.mxu3 %vm256_vm0, %v238_v15 }
  0x24   : > { %482 = vmatpush.msra.mxu1 %v405_v32  ;;  %856 = vmatpush.msra.mxu2 %v405_v32 }
  0x2b   : > { %808 = vmatmul.msk.f32.gmra.mxu0 %vm256_vm0, %v230_v10  ;;  %817 = vmatmul.msk.f32.gmra.mxu3 %vm256_vm0, %v239_v17 }
  0x33   : > { %809 = vmatmul.msk.f32.gmra.mxu0 %vm256_vm0, %v231_v11  ;;  %818 = vmatmul.msk.f32.gmra.mxu3 %vm256_vm0, %v240_v23 }
  0x3b   : > { %810 = vmatmul.msk.f32.gmra.mxu0 %vm256_vm0, %v232_v12  ;;  %819 = vmatmul.msk.f32.gmra.mxu3 %vm256_vm0, %v241_v27 }
  0x43   : > { %811 = vmatmul.msk.f32.gmra.mxu0 %vm256_vm0, %v233_v14  ;;  %820 = vmatmul.msk.f32.gmra.mxu3 %vm256_vm0, %v242_v28 }
  0x4b   : > { %812 = vmatmul.msk.f32.gmra.mxu0 %vm256_vm0, %v234_v16  ;;  %821 = vmatmul.msk.f32.gmra.mxu3 %vm256_vm0, %v243_v29 }
  0x53   : > { %813 = vmatmul.msk.f32.gmra.mxu0 %vm256_vm0, %v235_v22 }
  0x5b   : > { %814 = vmatmul.msk.f32.gmra.mxu0 %vm256_vm0, %v236_v26 }
  0x98   : > { %v322_v36 = vpop.f32.mrf.mxu0 }
  0x99   : > { %v323_v37 = vadd.f32 %v1073_v34, %v322_v36 }
  0x9b   : > { %v373_v38 = vmax.f32 %v323_v37, 0.0 }
  0x9d   : > { %v389_v39 = vsel %vm372_vm1, %v373_v38, %v323_v37  ;;  %v1145_v38 = vld [vmem:[%s1361_s4] ss:$0 sm:$0xff] }
  0x9e   : > { %822 = vmatmul.msk.f32.vlgmr.msra.gmra.mxu1 %vm418_vm2, %v389_v39  ;;  %v349_v0 = vpop.f32.mrf.mxu3 }
  0x9f   : > { %v350_v9 = vadd.f32 %v1073_v34, %v349_v0 }
  0xa0   : > { %v325_v40 = vpop.f32.mrf.mxu0 }
  0xa1   : > { %v326_v41 = vadd.f32 %v1073_v34, %v325_v40  ;;  %v382_v11 = vmax.f32 %v350_v9, 0.0 }
  0xa3   : > { %v374_v42 = vmax.f32 %v326_v41, 0.0  ;;  %v398_v14 = vsel %vm372_vm1, %v382_v11, %v350_v9 }
  0xa5   : > { %v390_v43 = vsel %vm372_vm1, %v374_v42, %v326_v41 }
  0xa6   : > { %823 = vmatmul.msk.f32.gmra.mxu1 %vm418_vm2, %v390_v43  ;;  %v352_v6 = vpop.f32.mrf.mxu3 }
  0xa7   : > { %v353_v13 = vadd.f32 %v1073_v34, %v352_v6 }
  0xa8   : > { %v328_v44 = vpop.f32.mrf.mxu0 }
  0xa9   : > { %v329_v45 = vadd.f32 %v1073_v34, %v328_v44  ;;  %v383_v15 = vmax.f32 %v353_v13, 0.0 }
  0xab   : > { %v375_v46 = vmax.f32 %v329_v45, 0.0  ;;  %v399_v18 = vsel %vm372_vm1, %v383_v15, %v353_v13 }
  0xad   : > { %v391_v47 = vsel %vm372_vm1, %v375_v46, %v329_v45 }
  0xae   : > { %824 = vmatmul.msk.f32.gmra.mxu1 %vm418_vm2, %v391_v47  ;;  %v355_v12 = vpop.f32.mrf.mxu3 }
  0xaf   : > { %v356_v17 = vadd.f32 %v1073_v34, %v355_v12 }
  0xb0   : > { %v331_v48 = vpop.f32.mrf.mxu0 }
  0xb1   : > { %v332_v49 = vadd.f32 %v1073_v34, %v331_v48  ;;  %v384_v19 = vmax.f32 %v356_v17, 0.0 }
  0xb3   : > { %v376_v50 = vmax.f32 %v332_v49, 0.0  ;;  %v400_v21 = vsel %vm372_vm1, %v384_v19, %v356_v17 }
  0xb5   : > { %v392_v51 = vsel %vm372_vm1, %v376_v50, %v332_v49 }
  0xb6   : > { %825 = vmatmul.msk.f32.gmra.mxu1 %vm418_vm2, %v392_v51  ;;  %v358_v16 = vpop.f32.mrf.mxu3 }
  0xb7   : > { %v359_v20 = vadd.f32 %v1073_v34, %v358_v16 }
  0xb8   : > { %v334_v52 = vpop.f32.mrf.mxu0 }
  0xb9   : > { %v335_v53 = vadd.f32 %v1073_v34, %v334_v52  ;;  %v385_v23 = vmax.f32 %v359_v20, 0.0 }
  0xbb   : > { %v377_v54 = vmax.f32 %v335_v53, 0.0  ;;  %v401_v25 = vsel %vm372_vm1, %v385_v23, %v359_v20 }
  0xbd   : > { %v393_v55 = vsel %vm372_vm1, %v377_v54, %v335_v53 }
  0xbe   : > { %826 = vmatmul.msk.f32.gmra.mxu1 %vm418_vm2, %v393_v55  ;;  %v361_v22 = vpop.f32.mrf.mxu3 }
  0xbf   : > { %v362_v24 = vadd.f32 %v1073_v34, %v361_v22 }
  0xc0   : > { %v337_v56 = vpop.f32.mrf.mxu0 }
  0xc1   : > { %v338_v57 = vadd.f32 %v1073_v34, %v337_v56  ;;  %v386_v27 = vmax.f32 %v362_v24, 0.0 }
  0xc3   : > { %v378_v58 = vmax.f32 %v338_v57, 0.0  ;;  %v402_v29 = vsel %vm372_vm1, %v386_v27, %v362_v24 }
  0xc5   : > { %v394_v59 = vsel %vm372_vm1, %v378_v58, %v338_v57 }
  0xc6   : > { %827 = vmatmul.msk.f32.gmra.mxu1 %vm418_vm2, %v394_v59  ;;  %v364_v26 = vpop.f32.mrf.mxu3 }
  0xc7   : > { %v365_v28 = vadd.f32 %v1073_v34, %v364_v26 }
  0xc8   : > { %v340_v60 = vpop.f32.mrf.mxu0 }
  0xc9   : > { %v341_v61 = vadd.f32 %v1073_v34, %v340_v60  ;;  %v387_v30 = vmax.f32 %v365_v28, 0.0 }
  0xcb   : > { %v379_v62 = vmax.f32 %v341_v61, 0.0  ;;  %v403_v33 = vsel %vm372_vm1, %v387_v30, %v365_v28 }
  0xcd   : > { %v395_v63 = vsel %vm372_vm1, %v379_v62, %v341_v61 }
  0xce   : > { %828 = vmatmul.msk.f32.gmra.mxu1 %vm418_vm2, %v395_v63  ;;  %v367_v31 = vpop.f32.mrf.mxu3 }
  0xcf   : > { %v368_v32 = vadd.f32 %v1073_v34, %v367_v31 }
  0xd0   : > { %v343_v1 = vpop.f32.mrf.mxu0 }
  0xd1   : > { %v344_v2 = vadd.f32 %v1073_v34, %v343_v1  ;;  %v388_v36 = vmax.f32 %v368_v32, 0.0 }
  0xd3   : > { %v380_v3 = vmax.f32 %v344_v2, 0.0  ;;  %v404_v37 = vsel %vm372_vm1, %v388_v36, %v368_v32 }
  0xd5   : > { %v396_v4 = vsel %vm372_vm1, %v380_v3, %v344_v2 }
  0xd6   : > { %829 = vmatmul.msk.f32.gmra.mxu1 %vm418_vm2, %v396_v4 }
  0xd8   : > { %v346_v5 = vpop.f32.mrf.mxu0 }
  0xd9   : > { %v347_v7 = vadd.f32 %v1073_v34, %v346_v5 }
  0xdb   : > { %v381_v8 = vmax.f32 %v347_v7, 0.0 }
  0xdd   : > { %v397_v10 = vsel %vm372_vm1, %v381_v8, %v347_v7 }
  0xde   : > { %830 = vmatmul.msk.f32.vlgmr.msra.gmra.mxu2 %vm418_vm2, %v397_v10 }
  0xe6   : > { %831 = vmatmul.msk.f32.gmra.mxu2 %vm418_vm2, %v398_v14 }
  0xee   : > { %832 = vmatmul.msk.f32.gmra.mxu2 %vm418_vm2, %v399_v18 }
  0xf6   : > { %833 = vmatmul.msk.f32.gmra.mxu2 %vm418_vm2, %v400_v21 }
  0xfe   : > { %834 = vmatmul.msk.f32.gmra.mxu2 %vm418_vm2, %v401_v25 }
 0x106   : > { %835 = vmatmul.msk.f32.gmra.mxu2 %vm418_vm2, %v402_v29 }
 0x10e   : > { %836 = vmatmul.msk.f32.gmra.mxu2 %vm418_vm2, %v403_v33 }
 0x116   : > { %837 = vmatmul.msk.f32.gmra.mxu2 %vm418_vm2, %v404_v37 }
 0x11b   : > { %v484_v39 = vpop.f32.mrf.mxu1 }
 0x11c   : > { %v485_v34 = vadd.f32 %v1145_v38, %v484_v39 }
 0x11e   : > { %v533_v40 = vsel %vm532_vm3, %v485_v34, -inf }
 0x11f   : > { %534 = vmax.xlane.f32.xlu0 %v533_v40 }
 0x123   : > { %v487_v41 = vpop.f32.mrf.mxu1 }
 0x124   : > { %v488_v42 = vadd.f32 %v1145_v38, %v487_v41 }
 0x126   : > { %v536_v35 = vsel %vm532_vm3, %v488_v42, -inf }
 0x127   : > { %537 = vmax.xlane.f32.xlu0 %v536_v35 }
 0x12b   : > { %v490_v43 = vpop.f32.mrf.mxu1 }
 0x12c   : > { %v1152_v44 = vadd.f32 %v1145_v38, %v490_v43 }
 0x12e   : > { %v539_v45 = vsel %vm532_vm3, %v1152_v44, -inf }
 0x12f   : > { %540 = vmax.xlane.f32.xlu1 %v539_v45 }
 0x133   : > { %v493_v46 = vpop.f32.mrf.mxu1 }
 0x134   : > { %v1157_v47 = vadd.f32 %v1145_v38, %v493_v46 }
 0x136   : > { %v542_v48 = vsel %vm532_vm3, %v1157_v47, -inf }
 0x137   : > { %543 = vmax.xlane.f32.xlu1 %v542_v48 }
 0x13b   : > { %v496_v49 = vpop.f32.mrf.mxu1 }
 0x13c   : > { %v1162_v50 = vadd.f32 %v1145_v38, %v496_v49 }
 0x13e   : > { %v545_v51 = vsel %vm532_vm3, %v1162_v50, -inf }
 0x13f   : > { %546 = vmax.xlane.f32.xlu2 %v545_v51 }
 0x143   : > { %v499_v52 = vpop.f32.mrf.mxu1 }
 0x144   : > { %v1167_v53 = vadd.f32 %v1145_v38, %v499_v52 }
 0x146   : > { %v548_v54 = vsel %vm532_vm3, %v1167_v53, -inf }
 0x147   : > { %549 = vmax.xlane.f32.xlu2 %v548_v54 }
 0x14b   : > { %v502_v55 = vpop.f32.mrf.mxu1 }
 0x14c   : > { %v1172_v56 = vadd.f32 %v1145_v38, %v502_v55 }
 0x14e   : > { %v551_v57 = vsel %vm532_vm3, %v1172_v56, -inf }
 0x14f   : > { %552 = vmax.xlane.f32.xlu0 %v551_v57 }
 0x153   : > { %v505_v58 = vpop.f32.mrf.mxu1 }
 0x154   : > { %v1177_v59 = vadd.f32 %v1145_v38, %v505_v58 }
 0x156   : > { %v554_v60 = vsel %vm532_vm3, %v1177_v59, -inf }
 0x157   : > { %555 = vmax.xlane.f32.xlu1 %v554_v60 }
 0x161   : > { %v508_v61 = vpop.f32.mrf.mxu2 }
 0x162   : > { %v1182_v62 = vadd.f32 %v1145_v38, %v508_v61 }
 0x164   : > { %v557_v63 = vsel %vm532_vm3, %v1182_v62, -inf }
 0x165   : > { %558 = vmax.xlane.f32.xlu2 %v557_v63 }
 0x169   : > { %v511_v0 = vpop.f32.mrf.mxu2 }
 0x16a   : > { %v1187_v1 = vadd.f32 %v1145_v38, %v511_v0 }
 0x16c   : > { %v560_v2 = vsel %vm532_vm3, %v1187_v1, -inf }
 0x16d   : > { %561 = vmax.xlane.f32.xlu0 %v560_v2 }
 0x171   : > { %v514_v3 = vpop.f32.mrf.mxu2 }
 0x172   : > { %v1192_v4 = vadd.f32 %v1145_v38, %v514_v3 }
 0x174   : > { %v563_v5 = vsel %vm532_vm3, %v1192_v4, -inf }
 0x175   : > { %564 = vmax.xlane.f32.xlu1 %v563_v5 }
 0x179   : > { %v517_v6 = vpop.f32.mrf.mxu2 }
 0x17a   : > { %v1197_v7 = vadd.f32 %v1145_v38, %v517_v6 }
 0x17c   : > { %v566_v8 = vsel %vm532_vm3, %v1197_v7, -inf }
 0x17d   : > { %567 = vmax.xlane.f32.xlu2 %v566_v8 }
 0x181   : > { %v520_v9 = vpop.f32.mrf.mxu2 }
 0x182   : > { %v1202_v10 = vadd.f32 %v1145_v38, %v520_v9 }
 0x184   : > { %v569_v11 = vsel %vm532_vm3, %v1202_v10, -inf }
 0x185   : > { %570 = vmax.xlane.f32.xlu0 %v569_v11 }
 0x189   : > { %v523_v12 = vpop.f32.mrf.mxu2 }
 0x18a   : > { %v1207_v13 = vadd.f32 %v1145_v38, %v523_v12 }
 0x18c   : > { %v572_v14 = vsel %vm532_vm3, %v1207_v13, -inf }
 0x18d   : > { %573 = vmax.xlane.f32.xlu1 %v572_v14 }
 0x191   : > { %v526_v15 = vpop.f32.mrf.mxu2 }
 0x192   : > { %v1212_v16 = vadd.f32 %v1145_v38, %v526_v15  ;;  %v535_v17 = vpop.xlane.xlu0 %534 }
 0x193   : > { %v1214_v18 = vsub.f32 %v485_v34, %v535_v17 }
 0x194   : > { %v575_v19 = vsel %vm532_vm3, %v1212_v16, -inf }
 0x195   : > { %v597_v20 = vmul.f32 1.442695, %v1214_v18  ;;  %576 = vmax.xlane.f32.xlu2 %v575_v19 }
 0x197   : > { %867 = vpow2.f32 %v597_v20 }
 0x199   : > { %v529_v21 = vpop.f32.mrf.mxu2 }
 0x19a   : > { %v1220_v22 = vadd.f32 %v1145_v38, %v529_v21  ;;  %v538_v23 = vpop.xlane.xlu0 %537 }
 0x19b   : > { %v1222_v24 = vsub.f32 %v488_v42, %v538_v23 }
 0x19c   : > { %v578_v25 = vsel %vm532_vm3, %v1220_v22, -inf }
 0x19d   : > { %v868_v26 = vpop.eup %867  ;;  %v599_v27 = vmul.f32 1.442695, %v1222_v24  ;;  %579 = vmax.xlane.f32.xlu0 %v578_v25 }
 0x19e   : > { %v629_v28 = vsel %vm532_vm3, %v868_v26, 0.0 }
 0x19f   : > { %869 = vpow2.f32 %v599_v27  ;;  %630 = vadd.xlane.f32.xlu1 %v629_v28 }
 0x1a2   : > { %v541_v29 = vpop.xlane.xlu1 %540 }
 0x1a3   : > { %v1229_v30 = vsub.f32 %v1152_v44, %v541_v29 }
 0x1a5   : > { %v870_v31 = vpop.eup %869  ;;  %v601_v32 = vmul.f32 1.442695, %v1229_v30 }
 0x1a6   : > { %v632_v33 = vsel %vm532_vm3, %v870_v31, 0.0 }
 0x1a7   : > { %871 = vpow2.f32 %v601_v32  ;;  %633 = vadd.xlane.f32.xlu2 %v632_v33 }
 0x1aa   : > { %v544_v36 = vpop.xlane.xlu1 %543 }
 0x1ab   : > { %v1234_v37 = vsub.f32 %v1157_v47, %v544_v36 }
 0x1ad   : > { %v872_v38 = vpop.eup %871  ;;  %v603_v39 = vmul.f32 1.442695, %v1234_v37 }
 0x1ae   : > { %v635_v34 = vsel %vm532_vm3, %v872_v38, 0.0 }
 0x1af   : > { %873 = vpow2.f32 %v603_v39  ;;  %636 = vadd.xlane.f32.xlu0 %v635_v34 }
 0x1b2   : > { %v547_v40 = vpop.xlane.xlu2 %546 }
 0x1b3   : > { %v1239_v41 = vsub.f32 %v1162_v50, %v547_v40 }
 0x1b5   : > { %v874_v42 = vpop.eup %873  ;;  %v605_v35 = vmul.f32 1.442695, %v1239_v41 }
 0x1b6   : > { %v638_v43 = vsel %vm532_vm3, %v874_v42, 0.0 }
 0x1b7   : > { %875 = vpow2.f32 %v605_v35  ;;  %639 = vadd.xlane.f32.xlu1 %v638_v43 }
 0x1ba   : > { %v550_v44 = vpop.xlane.xlu2 %549 }
 0x1bb   : > { %v1244_v45 = vsub.f32 %v1167_v53, %v550_v44 }
 0x1bd   : > { %v876_v46 = vpop.eup %875  ;;  %v607_v47 = vmul.f32 1.442695, %v1244_v45 }
 0x1be   : > { %v641_v48 = vsel %vm532_vm3, %v876_v46, 0.0 }
 0x1bf   : > { %877 = vpow2.f32 %v607_v47  ;;  %642 = vadd.xlane.f32.xlu2 %v641_v48 }
 0x1c2   : > { %v553_v49 = vpop.xlane.xlu0 %552 }
 0x1c3   : > { %v1249_v50 = vsub.f32 %v1172_v56, %v553_v49 }
 0x1c5   : > { %v878_v51 = vpop.eup %877  ;;  %v609_v52 = vmul.f32 1.442695, %v1249_v50 }
 0x1c6   : > { %v644_v54 = vsel %vm532_vm3, %v878_v51, 0.0 }
 0x1c7   : > { %879 = vpow2.f32 %v609_v52  ;;  %645 = vadd.xlane.f32.xlu0 %v644_v54 }
 0x1ca   : > { %v556_v53 = vpop.xlane.xlu1 %555 }
 0x1cb   : > { %v1254_v55 = vsub.f32 %v1177_v59, %v556_v53 }
 0x1cd   : > { %v880_v57 = vpop.eup %879  ;;  %v611_v58 = vmul.f32 1.442695, %v1254_v55 }
 0x1ce   : > { %v647_v60 = vsel %vm532_vm3, %v880_v57, 0.0 }
 0x1cf   : > { %881 = vpow2.f32 %v611_v58  ;;  %648 = vadd.xlane.f32.xlu1 %v647_v60 }
 0x1d5   : > { %v882_v56 = vpop.eup %881 }
 0x1d6   : > { %v650_v61 = vsel %vm532_vm3, %v882_v56, 0.0 }
 0x1d7   : > { %651 = vadd.xlane.f32.xlu2 %v650_v61 }
 0x1d8   : > { %v559_v63 = vpop.xlane.xlu2 %558 }
 0x1d9   : > { %v1260_v0 = vsub.f32 %v1182_v62, %v559_v63 }
 0x1db   : > { %v613_v2 = vmul.f32 1.442695, %v1260_v0 }
 0x1dd   : > { %883 = vpow2.f32 %v613_v2 }
 0x1e0   : > { %v562_v59 = vpop.xlane.xlu0 %561 }
 0x1e1   : > { %v1264_v3 = vsub.f32 %v1187_v1, %v562_v59 }
 0x1e3   : > { %v884_v5 = vpop.eup %883  ;;  %v615_v6 = vmul.f32 1.442695, %v1264_v3 }
 0x1e4   : > { %v653_v8 = vsel %vm532_vm3, %v884_v5, 0.0 }
 0x1e5   : > { %885 = vpow2.f32 %v615_v6  ;;  %654 = vadd.xlane.f32.xlu0 %v653_v8 }
 0x1e8   : > { %v565_v9 = vpop.xlane.xlu1 %564 }
 0x1e9   : > { %v1269_v11 = vsub.f32 %v1192_v4, %v565_v9 }
 0x1eb   : > { %v886_v62 = vpop.eup %885  ;;  %v617_v12 = vmul.f32 1.442695, %v1269_v11 }
 0x1ec   : > { %v656_v14 = vsel %vm532_vm3, %v886_v62, 0.0 }
 0x1ed   : > { %887 = vpow2.f32 %v617_v12  ;;  %657 = vadd.xlane.f32.xlu1 %v656_v14 }
 0x1f0   : > { %v568_v1 = vpop.xlane.xlu2 %567 }
 0x1f1   : > { %v1274_v15 = vsub.f32 %v1197_v7, %v568_v1 }
 0x1f3   : > { %v888_v17 = vpop.eup %887  ;;  %v619_v19 = vmul.f32 1.442695, %v1274_v15 }
 0x1f4   : > { %v659_v20 = vsel %vm532_vm3, %v888_v17, 0.0 }
 0x1f5   : > { %889 = vpow2.f32 %v619_v19  ;;  %660 = vadd.xlane.f32.xlu2 %v659_v20 }
 0x1f8   : > { %v571_v4 = vpop.xlane.xlu0 %570 }
 0x1f9   : > { %v1279_v21 = vsub.f32 %v1202_v10, %v571_v4 }
 0x1fb   : > { %v890_v23 = vpop.eup %889  ;;  %v621_v25 = vmul.f32 1.442695, %v1279_v21 }
 0x1fc   : > { %v662_v26 = vsel %vm532_vm3, %v890_v23, 0.0 }
 0x1fd   : > { %891 = vpow2.f32 %v621_v25  ;;  %663 = vadd.xlane.f32.xlu0 %v662_v26 }
 0x200   : > { %v574_v7 = vpop.xlane.xlu1 %573 }
 0x201   : > { %v1284_v27 = vsub.f32 %v1207_v13, %v574_v7 }
 0x203   : > { %v892_v28 = vpop.eup %891  ;;  %v623_v29 = vmul.f32 1.442695, %v1284_v27 }
 0x204   : > { %v665_v31 = vsel %vm532_vm3, %v892_v28, 0.0 }
 0x205   : > { %893 = vpow2.f32 %v623_v29  ;;  %666 = vadd.xlane.f32.xlu1 %v665_v31 }
 0x208   : > { %v577_v10 = vpop.xlane.xlu2 %576 }
 0x209   : > { %v1289_v32 = vsub.f32 %v1212_v16, %v577_v10 }
 0x20b   : > { %v894_v33 = vpop.eup %893  ;;  %v625_v36 = vmul.f32 1.442695, %v1289_v32 }
 0x20c   : > { %v668_v38 = vsel %vm532_vm3, %v894_v33, 0.0 }
 0x20d   : > { %895 = vpow2.f32 %v625_v36  ;;  %669 = vadd.xlane.f32.xlu2 %v668_v38 }
 0x210   : > { %v580_v13 = vpop.xlane.xlu0 %579 }
 0x211   : > { %v1294_v39 = vsub.f32 %v1220_v22, %v580_v13 }
 0x212   : > { %v631_v34 = vpop.xlane.xlu1 %630 }
 0x213   : > { %v896_v40 = vpop.eup %895  ;;  %v627_v42 = vmul.f32 1.442695, %v1294_v39  ;;  %897 = vlog2.f32 %v631_v34 }
 0x214   : > { %v671_v16 = vsel %vm532_vm3, %v896_v40, 0.0 }
 0x215   : > { %899 = vpow2.f32 %v627_v42  ;;  %672 = vadd.xlane.f32.xlu0 %v671_v16 }
 0x219   : > { %v898_v35 = vpop.eup %897 }
 0x21a   : > { %v678_v43 = vmul.f32 0.6931472, %v898_v35  ;;  %v634_v44 = vpop.xlane.xlu2 %633 }
 0x21b   : > { %v900_v46 = vpop.eup %899  ;;  %901 = vlog2.f32 %v634_v44 }
 0x21c   : > { %v709_v22 = vsub.f32 %v1214_v18, %v678_v43  ;;  %v674_v47 = vsel %vm532_vm3, %v900_v46, 0.0 }
 0x21d   : > { %675 = vadd.xlane.f32.xlu1 %v674_v47 }
 0x21e   : > { %725 = vst.msk [vmem:[%s1303_s19] sm:$0xff] %vm532_vm3, %v709_v22 }
 0x221   : > { %v902_v48 = vpop.eup %901 }
 0x222   : > { %v680_v49 = vmul.f32 0.6931472, %v902_v48  ;;  %v637_v51 = vpop.xlane.xlu0 %636 }
 0x223   : > { %903 = vlog2.f32 %v637_v51 }
 0x224   : > { %v710_v52 = vsub.f32 %v1222_v24, %v680_v49 }
 0x226   : > { %726 = vst.msk [vmem:[%s1303_s19 + $0x8] sm:$0xff] %vm532_vm3, %v710_v52 }
 0x229   : > { %v904_v54 = vpop.eup %903 }
 0x22a   : > { %v682_v53 = vmul.f32 0.6931472, %v904_v54  ;;  %v640_v57 = vpop.xlane.xlu1 %639 }
 0x22b   : > { %905 = vlog2.f32 %v640_v57 }
 0x22c   : > { %v711_v18 = vsub.f32 %v1229_v30, %v682_v53 }
 0x22e   : > { %727 = vst.msk [vmem:[%s1303_s19 + $0x10] sm:$0xff] %vm532_vm3, %v711_v18 }
 0x231   : > { %v906_v58 = vpop.eup %905 }
 0x232   : > { %v684_v60 = vmul.f32 0.6931472, %v906_v58  ;;  %v643_v56 = vpop.xlane.xlu2 %642 }
 0x233   : > { %907 = vlog2.f32 %v643_v56 }
 0x234   : > { %v712_v61 = vsub.f32 %v1234_v37, %v684_v60 }
 0x236   : > { %728 = vst.msk [vmem:[%s1303_s19 + $0x18] sm:$0xff] %vm532_vm3, %v712_v61 }
 0x239   : > { %v908_v24 = vpop.eup %907 }
 0x23a   : > { %v686_v63 = vmul.f32 0.6931472, %v908_v24  ;;  %v646_v2 = vpop.xlane.xlu0 %645 }
 0x23b   : > { %909 = vlog2.f32 %v646_v2 }
 0x23c   : > { %v713_v59 = vsub.f32 %v1239_v41, %v686_v63 }
 0x23e   : > { %729 = vst.msk [vmem:[%s1303_s19 + $0x20] sm:$0xff] %vm532_vm3, %v713_v59 }
 0x241   : > { %v910_v30 = vpop.eup %909 }
 0x242   : > { %v688_v5 = vmul.f32 0.6931472, %v910_v30  ;;  %v649_v6 = vpop.xlane.xlu1 %648 }
 0x243   : > { %911 = vlog2.f32 %v649_v6 }
 0x244   : > { %v714_v8 = vsub.f32 %v1244_v45, %v688_v5 }
 0x246   : > { %730 = vst.msk [vmem:[%s1303_s19 + $0x28] sm:$0xff] %vm532_vm3, %v714_v8 }
 0x249   : > { %v912_v37 = vpop.eup %911 }
 0x24a   : > { %v690_v9 = vmul.f32 0.6931472, %v912_v37  ;;  %v652_v62 = vpop.xlane.xlu2 %651 }
 0x24b   : > { %913 = vlog2.f32 %v652_v62 }
 0x24c   : > { %v715_v12 = vsub.f32 %v1249_v50, %v690_v9 }
 0x24e   : > { %731 = vst.msk [vmem:[%s1303_s19 + $0x30] sm:$0xff] %vm532_vm3, %v715_v12 }
 0x251   : > { %v914_v41 = vpop.eup %913 }
 0x252   : > { %v692_v14 = vmul.f32 0.6931472, %v914_v41 }
 0x254   : > { %v716_v1 = vsub.f32 %v1254_v55, %v692_v14 }
 0x256   : > { %732 = vst.msk [vmem:[%s1303_s19 + $0x38] sm:$0xff] %vm532_vm3, %v716_v1 }
 0x258   : > { %v655_v17 = vpop.xlane.xlu0 %654 }
 0x259   : > { %915 = vlog2.f32 %v655_v17 }
 0x25f   : > { %v916_v45 = vpop.eup %915 }
 0x260   : > { %v694_v19 = vmul.f32 0.6931472, %v916_v45  ;;  %v658_v20 = vpop.xlane.xlu1 %657 }
 0x261   : > { %917 = vlog2.f32 %v658_v20 }
 0x262   : > { %v717_v4 = vsub.f32 %v1260_v0, %v694_v19 }
 0x264   : > { %733 = vst.msk [vmem:[%s1303_s19 + $0x40] sm:$0xff] %vm532_vm3, %v717_v4 }
 0x267   : > { %v918_v50 = vpop.eup %917 }
 0x268   : > { %v696_v23 = vmul.f32 0.6931472, %v918_v50  ;;  %v661_v25 = vpop.xlane.xlu2 %660 }
 0x269   : > { %919 = vlog2.f32 %v661_v25 }
 0x26a   : > { %v718_v55 = vsub.f32 %v1264_v3, %v696_v23 }
 0x26c   : > { %734 = vst.msk [vmem:[%s1303_s19 + $0x48] sm:$0xff] %vm532_vm3, %v718_v55 }
 0x26f   : > { %v920_v26 = vpop.eup %919 }
 0x270   : > { %v698_v7 = vmul.f32 0.6931472, %v920_v26  ;;  %v664_v28 = vpop.xlane.xlu0 %663 }
 0x271   : > { %921 = vlog2.f32 %v664_v28 }
 0x272   : > { %v719_v29 = vsub.f32 %v1269_v11, %v698_v7 }
 0x274   : > { %735 = vst.msk [vmem:[%s1303_s19 + $0x50] sm:$0xff] %vm532_vm3, %v719_v29 }
 0x277   : > { %v922_v0 = vpop.eup %921 }
 0x278   : > { %v700_v31 = vmul.f32 0.6931472, %v922_v0  ;;  %v667_v10 = vpop.xlane.xlu1 %666 }
 0x279   : > { %923 = vlog2.f32 %v667_v10 }
 0x27a   : > { %v720_v33 = vsub.f32 %v1274_v15, %v700_v31 }
 0x27c   : > { %736 = vst.msk [vmem:[%s1303_s19 + $0x58] sm:$0xff] %vm532_vm3, %v720_v33 }
 0x27f   : > { %v924_v3 = vpop.eup %923 }
 0x280   : > { %v702_v36 = vmul.f32 0.6931472, %v924_v3  ;;  %v670_v38 = vpop.xlane.xlu2 %669 }
 0x281   : > { %925 = vlog2.f32 %v670_v38 }
 0x282   : > { %v721_v13 = vsub.f32 %v1279_v21, %v702_v36 }
 0x284   : > { %737 = vst.msk [vmem:[%s1303_s19 + $0x60] sm:$0xff] %vm532_vm3, %v721_v13 }
 0x287   : > { %v926_v11 = vpop.eup %925 }
 0x288   : > { %v704_v34 = vmul.f32 0.6931472, %v926_v11  ;;  %v673_v40 = vpop.xlane.xlu0 %672 }
 0x289   : > { %927 = vlog2.f32 %v673_v40 }
 0x28a   : > { %v722_v42 = vsub.f32 %v1284_v27, %v704_v34 }
 0x28c   : > { %738 = vst.msk [vmem:[%s1303_s19 + $0x68] sm:$0xff] %vm532_vm3, %v722_v42 }
 0x28f   : > { %v928_v15 = vpop.eup %927 }
 0x290   : > { %v706_v16 = vmul.f32 0.6931472, %v928_v15  ;;  %v676_v35 = vpop.xlane.xlu1 %675 }
 0x291   : > { %929 = vlog2.f32 %v676_v35 }
 0x292   : > { %v723_v43 = vsub.f32 %v1289_v32, %v706_v16 }
 0x294   : > { %739 = vst.msk [vmem:[%s1303_s19 + $0x70] sm:$0xff] %vm532_vm3, %v723_v43 }
 0x297   : > { %v930_v21 = vpop.eup %929 }
 0x298   : > { %v708_v44 = vmul.f32 0.6931472, %v930_v21 }
 0x29a   : > { %v724_v46 = vsub.f32 %v1294_v39, %v708_v44 }
 0x29c   : > { %740 = vst.msk [vmem:[%s1303_s19 + $0x78] sm:$0xff] %vm532_vm3, %v724_v46 }
 0x29d PF: > { %s15_s18 = sadd.s32 1, %s937_s18  }
 0x29e   : > { %p12_p4 = scmp.ge.s32.totalorder %s15_s18, 6  }
 0x2a0   :  { %14 = sbr.rel (!%p12_p4) target bundleno = 1 (0x1), region = 70 }

</bundles_post_ra>
